<compile_context>
chip_gen: v5e
topology: v5e:2x2
jax: 0.10.0
libtpu: 0.0.40
codegen_flags: <defaults>
</compile_context>

<pallas_src>
import functools

import jax
import jax.numpy as jnp
from jax.experimental import pallas as pl
from jax.experimental.pallas import tpu as pltpu


# ----------------------------------------------------------------------------- kernel
def _point_code_gen_kernel(
    x_ref,
    w15_ref, b15_ref,
    w26_ref, b26_ref,
    w37_ref, b37_ref,
    w48_ref, b48_ref,
    out_ref,
):
    x = x_ref[...]                                                   # (TB, 100)

    def layer(h, w_ref, b_ref, relu):
        y = jnp.dot(h, w_ref[...], preferred_element_type=jnp.float32) + b_ref[...]
        return jnp.maximum(y, 0.0) if relu else y

    h = layer(x, w15_ref, b15_ref, relu=True)                        # (TB, 128)
    h = layer(h, w26_ref, b26_ref, relu=True)                        # (TB,  64)
    h = layer(h, w37_ref, b37_ref, relu=True)                        # (TB, 128)
    out_ref[...] = layer(h, w48_ref, b48_ref, relu=False).astype(out_ref.dtype)


# ----------------------------------------------------------------------------- params
def init_params(key):
    """Deterministic init matching PyTorch Linear shapes.

    Weights stored as (in_features, out_features); biases as (1, out_features).
    """
    dims = [
        (100, 64), (64, 32), (32, 64), (64, 400),    # fc1..fc4  (code branch)
        (100, 64), (64, 32), (32, 64), (64, 12),     # fc5..fc8  (offset branch)
    ]
    params = []
    for i, (fan_in, fan_out) in enumerate(dims):
        kw, kb = jax.random.split(jax.random.fold_in(key, i))
        bound = 1.0 / jnp.sqrt(jnp.float32(fan_in))
        w = jax.random.uniform(kw, (fan_in, fan_out), jnp.float32, -bound, bound)
        b = jax.random.uniform(kb, (1, fan_out), jnp.float32, -bound, bound)
        params.append(w)
        params.append(b)
    return params


def _pack_params(params):
    """Fuse the two branches into concatenated / block-diagonal weights."""
    (w1, b1, w2, b2, w3, b3, w4, b4,
     w5, b5, w6, b6, w7, b7, w8, b8) = params
    f32 = jnp.float32

    w15 = jnp.concatenate([w1, w5], axis=1)                              # (100, 128)
    b15 = jnp.concatenate([b1, b5], axis=1)                              # (1, 128)

    w26 = jnp.zeros((128, 64), f32).at[:64, :32].set(w2).at[64:, 32:].set(w6)
    b26 = jnp.concatenate([b2, b6], axis=1)                              # (1, 64)

    w37 = jnp.zeros((64, 128), f32).at[:32, :64].set(w3).at[32:, 64:].set(w7)
    b37 = jnp.concatenate([b3, b7], axis=1)                              # (1, 128)

    w48 = (jnp.zeros((128, 512), f32)
           .at[:64, :400].set(w4)
           .at[64:, 400:412].set(w8))                                    # (128, 512)
    b48 = (jnp.zeros((1, 512), f32)
           .at[:, :400].set(b4)
           .at[:, 400:412].set(b8))                                      # (1, 512)

    return (w15, b15, w26, b26, w37, b37, w48, b48)


# ----------------------------------------------------------------------------- wrapper
def _round_up(n, m):
    return ((n + m - 1) // m) * m


def point_code_gen(x, params, *, block_b=1024):
    """Forward pass. x: (B, 100) f32. Returns (code (B,4,100), offset (B,4,3))."""
    batch = x.shape[0]

    # Batch tile: multiple of 8 sublanes, capped so double-buffered tiles fit
    # comfortably in v7x's 64 MiB VMEM as well as v5e/v6e.
    tb = min(int(block_b), _round_up(batch, 8))
    tb = _round_up(tb, 8)
    b_pad = _round_up(batch, tb)
    if b_pad != batch:
        x = jnp.pad(x, ((0, b_pad - batch), (0, 0)))

    packed = _pack_params(params)
    param_elems = sum(int(p.size) for p in packed)

    # VMEM budget: double-buffered in/out tiles + activations + resident params.
    vmem_bytes = 4 * (2 * tb * (100 + 512) + tb * (128 + 64 + 128) + param_elems)
    vmem_limit = int(min(vmem_bytes + (8 << 20), 100 << 20))

    flops = 2 * b_pad * (100 * 128 + 128 * 64 + 64 * 128 + 128 * 512)
    bytes_accessed = 4 * (b_pad * (100 + 512) + param_elems)

    grid = (b_pad // tb,)
    x_spec = pl.BlockSpec((tb, 100), lambda i: (i, 0))
    # Constant block index -> packed weights/biases stay VMEM-resident across tiles.
    param_specs = [pl.BlockSpec(p.shape, lambda i: (0, 0)) for p in packed]
    out_spec = pl.BlockSpec((tb, 512), lambda i: (i, 0))

    out = pl.pallas_call(
        _point_code_gen_kernel,
        out_shape=jax.ShapeDtypeStruct((b_pad, 512), jnp.float32),
        grid=grid,
        in_specs=[x_spec] + param_specs,
        out_specs=out_spec,
        compiler_params=pltpu.CompilerParams(
            dimension_semantics=("parallel",),
            vmem_limit_bytes=vmem_limit,
        ),
        cost_estimate=pl.CostEstimate(
            flops=flops, transcendentals=0, bytes_accessed=bytes_accessed),
    )(x, *packed)

    out = out[:batch]
    code = out[:, 0:400].reshape(batch, 4, 100)
    offset = out[:, 400:412].reshape(batch, 4, 3)
    # NOTE: self.th (Tanh) is defined in PointCodeGen.__init__ but never used
    # in forward(), so it is intentionally not applied here.
    return code, offset


# ----------------------------------------------------------------------------- reference
def _reference(x, params):
    """Pure-JAX reference (unfused) for correctness check."""
    (w1, b1, w2, b2, w3, b3, w4, b4,
     w5, b5, w6, b6, w7, b7, w8, b8) = params
    r = lambda h: jnp.maximum(h, 0.0)
    h = r(x @ w1 + b1); h = r(h @ w2 + b2); h = r(h @ w3 + b3)
    code = (h @ w4 + b4).reshape(x.shape[0], 4, 100)
    g = r(x @ w5 + b5); g = r(g @ w6 + b6); g = r(g @ w7 + b7)
    offset = (g @ w8 + b8).reshape(x.shape[0], 4, 3)
    return code, offset


if __name__ == "__main__":
    key = jax.random.PRNGKey(0)
    k_x, k_p = jax.random.split(key)

    batch = 2
    x = jax.random.normal(k_x, (batch, 100), dtype=jnp.float32)
    params = init_params(k_p)

    code, offset = point_code_gen(x, params)
    jax.block_until_ready((code, offset))

    code_ref, offset_ref = _reference(x, params)
    assert code.shape == (batch, 4, 100) and offset.shape == (batch, 4, 3)
    assert jnp.allclose(code, code_ref, atol=1e-5, rtol=1e-5)
    assert jnp.allclose(offset, offset_ref, atol=1e-5, rtol=1e-5)

    print("KERNEL_OK")
</pallas_src>

<mosaic_0001>
module attributes {stable_mosaic.version = 11 : i64} {
  func.func @_point_code_gen_kernel(%arg0: i32, %arg1: memref<8x100xf32, #tpu.memory_space<vmem>>, %arg2: memref<100x128xf32, #tpu.memory_space<vmem>>, %arg3: memref<1x128xf32, #tpu.memory_space<vmem>>, %arg4: memref<128x64xf32, #tpu.memory_space<vmem>>, %arg5: memref<1x64xf32, #tpu.memory_space<vmem>>, %arg6: memref<64x128xf32, #tpu.memory_space<vmem>>, %arg7: memref<1x128xf32, #tpu.memory_space<vmem>>, %arg8: memref<128x512xf32, #tpu.memory_space<vmem>>, %arg9: memref<1x512xf32, #tpu.memory_space<vmem>>, %arg10: memref<8x512xf32, #tpu.memory_space<vmem>>) attributes {dimension_semantics = [#tpu.dimension_semantics<parallel>], iteration_bounds = array<i64: 1>, scalar_prefetch = 0 : i64, scratch_operands = 0 : i64, tpu.core_type = #tpu.core_type<tc>, window_params = [{transform_indices = @transform_0, window_bounds = array<i64: 8, 100>}, {pipeline_mode = #tpu.pipeline_mode<synchronous>, transform_indices = @transform_1, window_bounds = array<i64: 100, 128>}, {pipeline_mode = #tpu.pipeline_mode<synchronous>, transform_indices = @transform_2, window_bounds = array<i64: 1, 128>}, {pipeline_mode = #tpu.pipeline_mode<synchronous>, transform_indices = @transform_3, window_bounds = array<i64: 128, 64>}, {pipeline_mode = #tpu.pipeline_mode<synchronous>, transform_indices = @transform_4, window_bounds = array<i64: 1, 64>}, {pipeline_mode = #tpu.pipeline_mode<synchronous>, transform_indices = @transform_5, window_bounds = array<i64: 64, 128>}, {pipeline_mode = #tpu.pipeline_mode<synchronous>, transform_indices = @transform_6, window_bounds = array<i64: 1, 128>}, {pipeline_mode = #tpu.pipeline_mode<synchronous>, transform_indices = @transform_7, window_bounds = array<i64: 128, 512>}, {pipeline_mode = #tpu.pipeline_mode<synchronous>, transform_indices = @transform_8, window_bounds = array<i64: 1, 512>}, {transform_indices = @transform_9, window_bounds = array<i64: 8, 512>}]} {
    %c0 = arith.constant 0 : index
    %c0_0 = arith.constant 0 : index
    %0 = vector.load %arg1[%c0, %c0_0] : memref<8x100xf32, #tpu.memory_space<vmem>>, vector<8x100xf32>
    %c0_1 = arith.constant 0 : index
    %c0_2 = arith.constant 0 : index
    %1 = vector.load %arg2[%c0_1, %c0_2] : memref<100x128xf32, #tpu.memory_space<vmem>>, vector<100x128xf32>
    %cst = arith.constant dense<0.000000e+00> : vector<8x128xf32>
    %2 = tpu.matmul %0, %1, %cst {dimension_numbers = #tpu.dot_dimension_numbers<[1], [0], [0], [1], [0, 0, 1, 1], [], []>} : vector<8x100xf32>, vector<100x128xf32>, vector<8x128xf32> -> vector<8x128xf32>
    %c0_3 = arith.constant 0 : index
    %c0_4 = arith.constant 0 : index
    %3 = vector.load %arg3[%c0_3, %c0_4] : memref<1x128xf32, #tpu.memory_space<vmem>>, vector<1x128xf32>
    %4 = vector.broadcast %3 : vector<1x128xf32> to vector<8x128xf32>
    %5 = arith.addf %2, %4 : vector<8x128xf32>
    %cst_5 = arith.constant 0.000000e+00 : f32
    %6 = vector.broadcast %cst_5 : f32 to vector<8x128xf32>
    %7 = arith.maximumf %5, %6 : vector<8x128xf32>
    %c0_6 = arith.constant 0 : index
    %c0_7 = arith.constant 0 : index
    %8 = vector.load %arg4[%c0_6, %c0_7] : memref<128x64xf32, #tpu.memory_space<vmem>>, vector<128x64xf32>
    %cst_8 = arith.constant dense<0.000000e+00> : vector<8x64xf32>
    %9 = tpu.matmul %7, %8, %cst_8 {dimension_numbers = #tpu.dot_dimension_numbers<[1], [0], [0], [1], [0, 0, 1, 1], [], []>} : vector<8x128xf32>, vector<128x64xf32>, vector<8x64xf32> -> vector<8x64xf32>
    %c0_9 = arith.constant 0 : index
    %c0_10 = arith.constant 0 : index
    %10 = vector.load %arg5[%c0_9, %c0_10] : memref<1x64xf32, #tpu.memory_space<vmem>>, vector<1x64xf32>
    %11 = vector.broadcast %10 : vector<1x64xf32> to vector<8x64xf32>
    %12 = arith.addf %9, %11 : vector<8x64xf32>
    %cst_11 = arith.constant 0.000000e+00 : f32
    %13 = vector.broadcast %cst_11 : f32 to vector<8x64xf32>
    %14 = arith.maximumf %12, %13 : vector<8x64xf32>
    %c0_12 = arith.constant 0 : index
    %c0_13 = arith.constant 0 : index
    %15 = vector.load %arg6[%c0_12, %c0_13] : memref<64x128xf32, #tpu.memory_space<vmem>>, vector<64x128xf32>
    %cst_14 = arith.constant dense<0.000000e+00> : vector<8x128xf32>
    %16 = tpu.matmul %14, %15, %cst_14 {dimension_numbers = #tpu.dot_dimension_numbers<[1], [0], [0], [1], [0, 0, 1, 1], [], []>} : vector<8x64xf32>, vector<64x128xf32>, vector<8x128xf32> -> vector<8x128xf32>
    %c0_15 = arith.constant 0 : index
    %c0_16 = arith.constant 0 : index
    %17 = vector.load %arg7[%c0_15, %c0_16] : memref<1x128xf32, #tpu.memory_space<vmem>>, vector<1x128xf32>
    %18 = vector.broadcast %17 : vector<1x128xf32> to vector<8x128xf32>
    %19 = arith.addf %16, %18 : vector<8x128xf32>
    %cst_17 = arith.constant 0.000000e+00 : f32
    %20 = vector.broadcast %cst_17 : f32 to vector<8x128xf32>
    %21 = arith.maximumf %19, %20 : vector<8x128xf32>
    %c0_18 = arith.constant 0 : index
    %c0_19 = arith.constant 0 : index
    %22 = vector.load %arg8[%c0_18, %c0_19] : memref<128x512xf32, #tpu.memory_space<vmem>>, vector<128x512xf32>
    %cst_20 = arith.constant dense<0.000000e+00> : vector<8x512xf32>
    %23 = tpu.matmul %21, %22, %cst_20 {dimension_numbers = #tpu.dot_dimension_numbers<[1], [0], [0], [1], [0, 0, 1, 1], [], []>} : vector<8x128xf32>, vector<128x512xf32>, vector<8x512xf32> -> vector<8x512xf32>
    %c0_21 = arith.constant 0 : index
    %c0_22 = arith.constant 0 : index
    %24 = vector.load %arg9[%c0_21, %c0_22] : memref<1x512xf32, #tpu.memory_space<vmem>>, vector<1x512xf32>
    %25 = vector.broadcast %24 : vector<1x512xf32> to vector<8x512xf32>
    %26 = arith.addf %23, %25 : vector<8x512xf32>
    %c0_23 = arith.constant 0 : index
    %c0_24 = arith.constant 0 : index
    %27 = vector.load %arg10[%c0_23, %c0_24] : memref<8x512xf32, #tpu.memory_space<vmem>>, vector<8x512xf32>
    tpu.vector_store %arg10[%c0_23, %c0_24], %26 {strides = array<i32>} : memref<8x512xf32, #tpu.memory_space<vmem>>, vector<8x512xf32>,
    return
  }
  func.func @transform_0(%arg0: i32) -> (i32, i32) {
    %c0_i32 = arith.constant 0 : i32
    %c0_i32_0 = arith.constant 0 : i32
    return %arg0, %c0_i32 : i32, i32
  }
  func.func @transform_1(%arg0: i32) -> (i32, i32) {
    %c0_i32 = arith.constant 0 : i32
    %c0_i32_0 = arith.constant 0 : i32
    %c0_i32_1 = arith.constant 0 : i32
    return %c0_i32, %c0_i32_0 : i32, i32
  }
  func.func @transform_2(%arg0: i32) -> (i32, i32) {
    %c0_i32 = arith.constant 0 : i32
    %c0_i32_0 = arith.constant 0 : i32
    %c0_i32_1 = arith.constant 0 : i32
    return %c0_i32, %c0_i32_0 : i32, i32
  }
  func.func @transform_3(%arg0: i32) -> (i32, i32) {
    %c0_i32 = arith.constant 0 : i32
    %c0_i32_0 = arith.constant 0 : i32
    %c0_i32_1 = arith.constant 0 : i32
    return %c0_i32, %c0_i32_0 : i32, i32
  }
  func.func @transform_4(%arg0: i32) -> (i32, i32) {
    %c0_i32 = arith.constant 0 : i32
    %c0_i32_0 = arith.constant 0 : i32
    %c0_i32_1 = arith.constant 0 : i32
    return %c0_i32, %c0_i32_0 : i32, i32
  }
  func.func @transform_5(%arg0: i32) -> (i32, i32) {
    %c0_i32 = arith.constant 0 : i32
    %c0_i32_0 = arith.constant 0 : i32
    %c0_i32_1 = arith.constant 0 : i32
    return %c0_i32, %c0_i32_0 : i32, i32
  }
  func.func @transform_6(%arg0: i32) -> (i32, i32) {
    %c0_i32 = arith.constant 0 : i32
    %c0_i32_0 = arith.constant 0 : i32
    %c0_i32_1 = arith.constant 0 : i32
    return %c0_i32, %c0_i32_0 : i32, i32
  }
  func.func @transform_7(%arg0: i32) -> (i32, i32) {
    %c0_i32 = arith.constant 0 : i32
    %c0_i32_0 = arith.constant 0 : i32
    %c0_i32_1 = arith.constant 0 : i32
    return %c0_i32, %c0_i32_0 : i32, i32
  }
  func.func @transform_8(%arg0: i32) -> (i32, i32) {
    %c0_i32 = arith.constant 0 : i32
    %c0_i32_0 = arith.constant 0 : i32
    %c0_i32_1 = arith.constant 0 : i32
    return %c0_i32, %c0_i32_0 : i32, i32
  }
  func.func @transform_9(%arg0: i32) -> (i32, i32) {
    %c0_i32 = arith.constant 0 : i32
    %c0_i32_0 = arith.constant 0 : i32
    return %arg0, %c0_i32 : i32, i32
  }
}

</mosaic_0001>

<bundles_post_ra>
// kernel: tpu_custom_call.1
= control target key start
LH: loop header
LB: loop body
LE: loop exit
PB: predicated region body
PF: predicated region fallthrough
CT: control target
= control target key end

     0   :  { %14 = vsyncpa [#allocation3], 0  ;;  %s597_s0 = inlined_call_operand.vmem [shape: f32[8,100], index: 0, kind: input, shape index: {}]   ;;  %s598_s1 = inlined_call_operand.vmem [shape: f32[100,128], index: 1, kind: input, shape index: {}]   ;;  %s599_s2 = inlined_call_operand.vmem [shape: f32[1,128], index: 2, kind: input, shape index: {}]   ;;  %s600_s3 = inlined_call_operand.vmem [shape: f32[128,64], index: 3, kind: input, shape index: {}]   ;;  %s601_s4 = inlined_call_operand.vmem [shape: f32[1,64], index: 4, kind: input, shape index: {}]   ;;  %s602_s5 = inlined_call_operand.vmem [shape: f32[64,128], index: 5, kind: input, shape index: {}]   ;;  %s603_s6 = inlined_call_operand.vmem [shape: f32[1,128], index: 6, kind: input, shape index: {}]   ;;  %s604_s7 = inlined_call_operand.hbm [shape: f32[128,512], index: 7, kind: input, shape index: {}]   ;;  %s605_s8 = inlined_call_operand.vmem [shape: f32[1,512], index: 8, kind: input, shape index: {}]   ;;  %s606_s9 = inlined_call_operand.hbm [shape: f32[8,512], index: 9, kind: output, shape index: {}]  }
   0x1   :  { %15 = vsyncpa [#allocation4], 0  ;;  %s34_s11 = sshll.u32 %s604_s7, 4  ;;  %s411_s12 = smov [#allocation2]   ;;  %s35_s11 = int_to_ptr.hbm [resolvable:$true] %s34_s11 }
   0x2   :  { %s36_s13 = sshll.u32 %s411_s12, 4  ;;  %s412_s14 = smov 512   ;;  %s37_s13 = int_to_ptr.vmem [resolvable:$true] %s36_s13 }
   0x3   :  { %s413_s15 = smov 32  }
   0x4   :  { %42 = dma.hbm_to_vmem [thread:$0]  %s35_s11, 8192, %s37_s13, [#allocation3], %s412_s14, %s412_s14, %s413_s15  }
   0x5   :  { %407 = dma.done.wait [#allocation3], 8192  }
   0x6   :  { %408 = vsyncadd [#allocation3], 4294959104  ;;  %vm71_vm0 = vcmask 1043456   ;;  %v62_v0 = vld [vmem:[%s598_s1 + $0x60] sm:$0xf]  ;;  %v61_v1 = vld [vmem:[%s598_s1 + $0x58] sm:$0xff] }
   0x7   :  { %349 = vmatpush.msk.msra.mxu0 %vm71_vm0, %v62_v0  ;;  %v60_v2 = vld [vmem:[%s598_s1 + $0x50] sm:$0xff]  ;;  %v59_v3 = vld [vmem:[%s598_s1 + $0x48] sm:$0xff]  ;;  %v111_v4 = vld [vmem:[%s600_s3 + $0x78] sm:$0xff]  ;;  %vm67_vm1 = vcmask 818176   ;;  %vm149_vm2 = vcmask 523264   ;;  %s339_s28 = sshll.u32 %s606_s9, 4  ;;  %s340_s28 = int_to_ptr.hbm [resolvable:$true] %s339_s28 }
   0x8   :  { %116 = vmatpush.msra.mxu1 %v111_v4  ;;  %v110_v5 = vld [vmem:[%s600_s3 + $0x70] sm:$0xff]  ;;  %v58_v6 = vld [vmem:[%s598_s1 + $0x40] sm:$0xff]  ;;  %v109_v7 = vld [vmem:[%s600_s3 + $0x68] sm:$0xff] }
   0x9   :  { %79 = vmatpush.msra.mxu0 %v61_v1  ;;  %v57_v8 = vld [vmem:[%s598_s1 + $0x38] sm:$0xff]  ;;  %v108_v9 = vld [vmem:[%s600_s3 + $0x60] sm:$0xff]  ;;  %v56_v10 = vld [vmem:[%s598_s1 + $0x30] sm:$0xff] }
   0xa   :  { %117 = vmatpush.msra.mxu1 %v110_v5  ;;  %v107_v11 = vld [vmem:[%s600_s3 + $0x58] sm:$0xff]  ;;  %v55_v12 = vld [vmem:[%s598_s1 + $0x28] sm:$0xff]  ;;  %v106_v13 = vld [vmem:[%s600_s3 + $0x50] sm:$0xff] }
   0xb   :  { %80 = vmatpush.msra.mxu0 %v60_v2  ;;  %v54_v14 = vld [vmem:[%s598_s1 + $0x20] sm:$0xff]  ;;  %v105_v15 = vld [vmem:[%s600_s3 + $0x48] sm:$0xff]  ;;  %v53_v16 = vld [vmem:[%s598_s1 + $0x18] sm:$0xff] }
   0xc   :  { %118 = vmatpush.msra.mxu1 %v109_v7  ;;  %v104_v17 = vld [vmem:[%s600_s3 + $0x40] sm:$0xff]  ;;  %v52_v18 = vld [vmem:[%s598_s1 + $0x10] sm:$0xff]  ;;  %v103_v19 = vld [vmem:[%s600_s3 + $0x38] sm:$0xff] }
   0xd   :  { %81 = vmatpush.msra.mxu0 %v59_v3  ;;  %v51_v20 = vld [vmem:[%s598_s1 + $0x8] sm:$0xff]  ;;  %v102_v21 = vld [vmem:[%s600_s3 + $0x30] sm:$0xff]  ;;  %v50_v22 = vld [vmem:[%s598_s1] sm:$0xff] }
   0xe   :  { %119 = vmatpush.msra.mxu1 %v108_v9  ;;  %v101_v23 = vld [vmem:[%s600_s3 + $0x28] sm:$0xff]  ;;  %v49_v24 = vld [vmem:[%s597_s0] sm:$0xff]  ;;  %v99_v26 = vld [vmem:[%s600_s3 + $0x18] sm:$0xff] }
   0xf   :  { %82 = vmatpush.msra.mxu0 %v58_v6  ;;  %v100_v25 = vld [vmem:[%s600_s3 + $0x20] sm:$0xff]  ;;  %v98_v27 = vld [vmem:[%s600_s3 + $0x10] sm:$0xff]  ;;  %v97_v28 = vld [vmem:[%s600_s3 + $0x8] sm:$0xff] }
  0x10   :  { %120 = vmatpush.msra.mxu1 %v107_v11  ;;  %v96_v29 = vld [vmem:[%s600_s3] sm:$0xff]  ;;  %v144_v30 = vld [vmem:[%s602_s5 + $0x38] sm:$0xff]  ;;  %v143_v31 = vld [vmem:[%s602_s5 + $0x30] sm:$0xff] }
  0x11   :  { %83 = vmatpush.msra.mxu0 %v57_v8  ;;  %161 = vmatpush.msra.mxu2 %v144_v30  ;;  %v142_v32 = vld [vmem:[%s602_s5 + $0x28] sm:$0xff]  ;;  %v141_v33 = vld [vmem:[%s602_s5 + $0x20] sm:$0xff]  ;;  %v140_v34 = vld [vmem:[%s602_s5 + $0x18] sm:$0xff] }
  0x12   :  { %121 = vmatpush.msra.mxu1 %v106_v13  ;;  %v356_v35 = vld [vmem:[%s599_s2] ss:$0 sm:$0xff]  ;;  %v139_v39 = vld [vmem:[%s602_s5 + $0x10] sm:$0xff]  ;;  %v138_v40 = vld [vmem:[%s602_s5 + $0x8] sm:$0xff] }
  0x13   :  { %84 = vmatpush.msra.mxu0 %v56_v10  ;;  %162 = vmatpush.msra.mxu2 %v143_v31  ;;  %v137_v41 = vld [vmem:[%s602_s5] sm:$0xff]  ;;  %v235_v43 = vld [vmem:[#allocation2 + $0x1e8] sm:$0xff]  ;;  %v236_v44 = vld [vmem:[#allocation2 + $0x1f0] sm:$0xff] }
  0x14   :  { %122 = vmatpush.msra.mxu1 %v105_v15  ;;  %v234_v42 = vld [vmem:[#allocation2 + $0x1e0] sm:$0xff]  ;;  %v237_v45 = vld [vmem:[#allocation2 + $0x1f8] sm:$0xff]  ;;  %v231_v47 = vld [vmem:[#allocation2 + $0x1c8] sm:$0xff] }
  0x15   :  { %85 = vmatpush.msra.mxu0 %v55_v12  ;;  %163 = vmatpush.msra.mxu2 %v142_v32  ;;  %v230_v46 = vld [vmem:[#allocation2 + $0x1c0] sm:$0xff]  ;;  %v232_v48 = vld [vmem:[#allocation2 + $0x1d0] sm:$0xff]  ;;  %v233_v49 = vld [vmem:[#allocation2 + $0x1d8] sm:$0xff] }
  0x16   :  { %123 = vmatpush.msra.mxu1 %v104_v17  ;;  %248 = vmatpush.msra.mxu3 %v234_v42  ;;  %v226_v50 = vld [vmem:[#allocation2 + $0x1a0] sm:$0xff]  ;;  %v227_v51 = vld [vmem:[#allocation2 + $0x1a8] sm:$0xff]  ;;  %v228_v52 = vld [vmem:[#allocation2 + $0x1b0] sm:$0xff] }
  0x17   :  { %86 = vmatpush.msra.mxu0 %v54_v14  ;;  %164 = vmatpush.msra.mxu2 %v141_v33  ;;  %v229_v53 = vld [vmem:[#allocation2 + $0x1b8] sm:$0xff]  ;;  %v222_v54 = vld [vmem:[#allocation2 + $0x180] sm:$0xff]  ;;  %v223_v55 = vld [vmem:[#allocation2 + $0x188] sm:$0xff] }
  0x18   :  { %124 = vmatpush.msra.mxu1 %v103_v19  ;;  %249 = vmatpush.msra.mxu3 %v230_v46  ;;  %v224_v56 = vld [vmem:[#allocation2 + $0x190] sm:$0xff]  ;;  %v225_v57 = vld [vmem:[#allocation2 + $0x198] sm:$0xff]  ;;  %v218_v58 = vld [vmem:[#allocation2 + $0x160] sm:$0xff] }
  0x19   :  { %87 = vmatpush.msra.mxu0 %v53_v16  ;;  %165 = vmatpush.msra.mxu2 %v140_v34  ;;  %v219_v59 = vld [vmem:[#allocation2 + $0x168] sm:$0xff]  ;;  %v220_v60 = vld [vmem:[#allocation2 + $0x170] sm:$0xff]  ;;  %v221_v61 = vld [vmem:[#allocation2 + $0x178] sm:$0xff] }
  0x1a   :  { %125 = vmatpush.msra.mxu1 %v102_v21  ;;  %250 = vmatpush.msra.mxu3 %v226_v50  ;;  %v214_v62 = vld [vmem:[#allocation2 + $0x140] sm:$0xff]  ;;  %v215_v63 = vld [vmem:[#allocation2 + $0x148] sm:$0xff]  ;;  %v216_v0 = vld [vmem:[#allocation2 + $0x150] sm:$0xff] }
  0x1b   :  { %88 = vmatpush.msra.mxu0 %v52_v18  ;;  %166 = vmatpush.msra.mxu2 %v139_v39  ;;  %v217_v1 = vld [vmem:[#allocation2 + $0x158] sm:$0xff]  ;;  %v210_v2 = vld [vmem:[#allocation2 + $0x120] sm:$0xff]  ;;  %v211_v3 = vld [vmem:[#allocation2 + $0x128] sm:$0xff] }
  0x1c   :  { %126 = vmatpush.msra.mxu1 %v101_v23  ;;  %251 = vmatpush.msra.mxu3 %v222_v54  ;;  %v212_v4 = vld [vmem:[#allocation2 + $0x130] sm:$0xff]  ;;  %v213_v5 = vld [vmem:[#allocation2 + $0x138] sm:$0xff]  ;;  %v206_v6 = vld [vmem:[#allocation2 + $0x100] sm:$0xff] }
  0x1d   :  { %89 = vmatpush.msra.mxu0 %v51_v20  ;;  %167 = vmatpush.msra.mxu2 %v138_v40  ;;  %v207_v7 = vld [vmem:[#allocation2 + $0x108] sm:$0xff]  ;;  %v208_v8 = vld [vmem:[#allocation2 + $0x110] sm:$0xff]  ;;  %v209_v9 = vld [vmem:[#allocation2 + $0x118] sm:$0xff] }
  0x1e   :  { %127 = vmatpush.msra.mxu1 %v100_v25  ;;  %252 = vmatpush.msra.mxu3 %v218_v58  ;;  %v202_v10 = vld [vmem:[#allocation2 + $0xe0] sm:$0xff]  ;;  %v203_v11 = vld [vmem:[#allocation2 + $0xe8] sm:$0xff]  ;;  %v204_v12 = vld [vmem:[#allocation2 + $0xf0] sm:$0xff] }
  0x1f   :  { %90 = vmatpush.msra.mxu0 %v50_v22  ;;  %168 = vmatpush.msra.mxu2 %v137_v41  ;;  %v205_v13 = vld [vmem:[#allocation2 + $0xf8] sm:$0xff]  ;;  %v198_v14 = vld [vmem:[#allocation2 + $0xc0] sm:$0xff]  ;;  %v199_v15 = vld [vmem:[#allocation2 + $0xc8] sm:$0xff] }
  0x20   :  { %350 = vmatmul.msk.f32.vlgmr.msra.gmra.mxu0 %vm67_vm1, %v49_v24  ;;  %128 = vmatpush.msra.mxu1 %v99_v26  ;;  %v200_v16 = vld [vmem:[#allocation2 + $0xd0] sm:$0xff]  ;;  %v201_v17 = vld [vmem:[#allocation2 + $0xd8] sm:$0xff]  ;;  %v194_v18 = vld [vmem:[#allocation2 + $0xa0] sm:$0xff] }
  0x21   :  { %268 = vmatpush.msrb.mxu2 %v235_v43  ;;  %288 = vmatpush.msrb.mxu0 %v236_v44  ;;  %v195_v19 = vld [vmem:[#allocation2 + $0xa8] sm:$0xff]  ;;  %v196_v20 = vld [vmem:[#allocation2 + $0xb0] sm:$0xff]  ;;  %v197_v21 = vld [vmem:[#allocation2 + $0xb8] sm:$0xff] }
  0x22   :  { %129 = vmatpush.msra.mxu1 %v98_v27  ;;  %253 = vmatpush.msra.mxu3 %v214_v62  ;;  %v190_v22 = vld [vmem:[#allocation2 + $0x80] sm:$0xff]  ;;  %v191_v23 = vld [vmem:[#allocation2 + $0x88] sm:$0xff]  ;;  %v192_v24 = vld [vmem:[#allocation2 + $0x90] sm:$0xff] }
  0x23   :  { %269 = vmatpush.msrb.mxu2 %v231_v47  ;;  %289 = vmatpush.msrb.mxu0 %v232_v48  ;;  %v193_v25 = vld [vmem:[#allocation2 + $0x98] sm:$0xff]  ;;  %v186_v26 = vld [vmem:[#allocation2 + $0x60] sm:$0xff]  ;;  %v187_v27 = vld [vmem:[#allocation2 + $0x68] sm:$0xff] }
  0x24   :  { %130 = vmatpush.msra.mxu1 %v97_v28  ;;  %254 = vmatpush.msra.mxu3 %v210_v2  ;;  %v188_v28 = vld [vmem:[#allocation2 + $0x70] sm:$0xff]  ;;  %v357_v30 = vld [vmem:[%s601_s4] ss:$0 sm:$0xff]  ;;  %v179_v39 = vld [vmem:[#allocation2 + $0x28] sm:$0xff] }
  0x25   :  { %270 = vmatpush.msrb.mxu2 %v227_v51  ;;  %290 = vmatpush.msrb.mxu0 %v228_v52  ;;  %v182_v34 = vld [vmem:[#allocation2 + $0x40] sm:$0xff]  ;;  %v180_v40 = vld [vmem:[#allocation2 + $0x30] sm:$0xff]  ;;  %v181_v41 = vld [vmem:[#allocation2 + $0x38] sm:$0xff] }
  0x26   :  { %131 = vmatpush.msra.mxu1 %v96_v29  ;;  %255 = vmatpush.msra.mxu3 %v206_v6  ;;  %v189_v29 = vld [vmem:[#allocation2 + $0x78] sm:$0xff]  ;;  %v174_v42 = vld [vmem:[#allocation2] sm:$0xff]  ;;  %v175_v43 = vld [vmem:[#allocation2 + $0x8] sm:$0xff] }
  0x27   :  { %271 = vmatpush.msrb.mxu2 %v223_v55  ;;  %291 = vmatpush.msrb.mxu0 %v224_v56  ;;  %v176_v44 = vld [vmem:[#allocation2 + $0x10] sm:$0xff]  ;;  %v358_v46 = vld [vmem:[%s603_s6] ss:$0 sm:$0xff]  ;;  %s414_s6 = smov [#allocation5]  }
  0x28   :  { %308 = vmatpush.msrb.mxu1 %v237_v45  ;;  %256 = vmatpush.msra.mxu3 %v202_v10  ;;  %v177_v45 = vld [vmem:[#allocation2 + $0x18] sm:$0xff]  ;;  %v238_v50 = vld [vmem:[%s605_s8] sm:$0xf]  ;;  %s337_s0 = sshll.u32 %s414_s6, 4  ;;  %s338_s0 = int_to_ptr.vmem [resolvable:$true] %s337_s0 }
  0x29   :  { %272 = vmatpush.msrb.mxu2 %v219_v59  ;;  %292 = vmatpush.msrb.mxu0 %v220_v60  ;;  %v242_v51 = vperm.slane %v238_v50, 2  ;;  %v243_v52 = vperm.slane %v238_v50, 3  ;;  %v241_v58 = vperm.slane %v238_v50, 1 }
  0x2a   :  { %309 = vmatpush.msrb.mxu1 %v233_v49  ;;  %257 = vmatpush.msra.mxu3 %v198_v14 }
  0x2b   :  { %273 = vmatpush.msrb.mxu2 %v215_v63  ;;  %293 = vmatpush.msrb.mxu0 %v216_v0 }
  0x2c   :  { %310 = vmatpush.msrb.mxu1 %v229_v53  ;;  %258 = vmatpush.msra.mxu3 %v194_v18 }
  0x2d   :  { %274 = vmatpush.msrb.mxu2 %v211_v3  ;;  %294 = vmatpush.msrb.mxu0 %v212_v4 }
  0x2e   :  { %311 = vmatpush.msrb.mxu1 %v225_v57  ;;  %259 = vmatpush.msra.mxu3 %v190_v22  ;;  %v240_v57 = vperm.slane %v238_v50, 0 }
  0x2f   :  { %275 = vmatpush.msrb.mxu2 %v207_v7  ;;  %295 = vmatpush.msrb.mxu0 %v208_v8 }
  0x30   :  { %312 = vmatpush.msrb.mxu1 %v221_v61  ;;  %260 = vmatpush.msra.mxu3 %v186_v26 }
  0x31   :  { %276 = vmatpush.msrb.mxu2 %v203_v11  ;;  %296 = vmatpush.msrb.mxu0 %v204_v12 }
  0x32   :  { %313 = vmatpush.msrb.mxu1 %v217_v1  ;;  %261 = vmatpush.msra.mxu3 %v182_v34 }
  0x33   :  { %277 = vmatpush.msrb.mxu2 %v199_v15  ;;  %297 = vmatpush.msrb.mxu0 %v200_v16 }
  0x34   :  { %314 = vmatpush.msrb.mxu1 %v213_v5 }
  0x35   :  { %278 = vmatpush.msrb.mxu2 %v195_v19  ;;  %298 = vmatpush.msrb.mxu0 %v196_v20 }
  0x36   :  { %315 = vmatpush.msrb.mxu1 %v209_v9 }
  0x37   :  { %279 = vmatpush.msrb.mxu2 %v191_v23  ;;  %299 = vmatpush.msrb.mxu0 %v192_v24 }
  0x38   :  { %316 = vmatpush.msrb.mxu1 %v205_v13 }
  0x39   :  { %280 = vmatpush.msrb.mxu2 %v187_v27  ;;  %300 = vmatpush.msrb.mxu0 %v188_v28 }
  0x3a   :  { %317 = vmatpush.msrb.mxu1 %v201_v17 }
  0x3c   :  { %318 = vmatpush.msrb.mxu1 %v197_v21 }
  0x3e   :  { %319 = vmatpush.msrb.mxu1 %v193_v25 }
  0x40   :  { %320 = vmatpush.msrb.mxu1 %v189_v29 }
  0x9d   :  { %v92_v36 = vpop.f32.mrf.mxu0 }
  0x9e   :  { %v93_v37 = vadd.f32 %v356_v35, %v92_v36  ;;  %v183_v35 = vld [vmem:[#allocation2 + $0x48] sm:$0xff]  ;;  %v184_v36 = vld [vmem:[#allocation2 + $0x50] sm:$0xff] }
  0x9f   :  { %281 = vmatpush.msrb.mxu2 %v183_v35  ;;  %301 = vmatpush.msrb.mxu0 %v184_v36 }
  0xa0   :  { %v95_v38 = vmax.f32 %v93_v37, 0.0  ;;  %v185_v37 = vld [vmem:[#allocation2 + $0x58] sm:$0xff] }
  0xa1   :  { %321 = vmatpush.msrb.mxu1 %v185_v37  ;;  %282 = vmatpush.msrb.mxu2 %v179_v39 }
  0xa2   :  { %132 = vmatmul.f32.vlgmr.msra.gmra.mxu1 %v95_v38  ;;  %v178_v38 = vld [vmem:[#allocation2 + $0x20] sm:$0xff]  ;;  %302 = vmatpush.msrb.mxu0 %v180_v40 }
  0xa3   :  { %262 = vmatpush.msra.mxu3 %v178_v38  ;;  %322 = vmatpush.msrb.mxu1 %v181_v41 }
  0xa4   :  { %283 = vmatpush.msrb.mxu2 %v175_v43  ;;  %303 = vmatpush.msrb.mxu0 %v176_v44 }
  0xa5   :  { %263 = vmatpush.msra.mxu3 %v174_v42  ;;  %323 = vmatpush.msrb.mxu1 %v177_v45 }
 0x11f   :  { %v133_v31 = vpop.f32.mrf.mxu1 }
 0x120   :  { %v134_v32 = vadd.f32 %v357_v30, %v133_v31 }
 0x122   :  { %v136_v33 = vmax.f32 %v134_v32, 0.0 }
 0x124   :  { %351 = vmatmul.msk.f32.vlgmr.msra.gmra.mxu2 %vm149_vm2, %v136_v33 }
 0x1a7   :  { %v170_v47 = vpop.f32.mrf.mxu2 }
 0x1a8   :  { %v171_v48 = vadd.f32 %v358_v46, %v170_v47 }
 0x1aa   :  { %v173_v49 = vmax.f32 %v171_v48, 0.0 }
 0x1ac   :  { %264 = vmatmul.f32.vlgmr.msra.gmra.mxu3 %v173_v49  ;;  %284 = vmatmul.f32.vlgmr.msrb.gmra.mxu2 %v173_v49 }
 0x1ad   :  { %304 = vmatmul.f32.vlgmr.msrb.gmra.mxu0 %v173_v49  ;;  %324 = vmatmul.f32.vlgmr.msrb.gmra.mxu1 %v173_v49 }
 0x22a   :  { %v305_v53 = vpop.f32.mrf.mxu0  ;;  %v325_v54 = vpop.f32.mrf.mxu1 }
 0x22b   :  { %v306_v55 = vadd.f32 %v305_v53, %v242_v51  ;;  %v326_v56 = vadd.f32 %v325_v54, %v243_v52 }
 0x22d   :  { %330 = vst [vmem:[#allocation5 + $0x10] sm:$0xff] %v306_v55 }
 0x22e   :  { %331 = vst [vmem:[#allocation5 + $0x18] sm:$0xff] %v326_v56 }
 0x22f   :  { %v265_v59 = vpop.f32.mrf.mxu3  ;;  %v285_v60 = vpop.f32.mrf.mxu2 }
 0x230   :  { %v266_v61 = vadd.f32 %v265_v59, %v240_v57  ;;  %v286_v62 = vadd.f32 %v285_v60, %v241_v58 }
 0x232   :  { %328 = vst [vmem:[#allocation5] sm:$0xff] %v266_v61 }
 0x233   :  { %329 = vst [vmem:[#allocation5 + $0x8] sm:$0xff] %v286_v62 }
 0x234   :  { %342 = dma.vmem_to_hbm [thread:$0]  %s338_s0, 512, %s340_s28, [#allocation4]  }
 0x235   :  { %409 = dma.done.wait [#allocation4], 512  }
 0x236   :  { %410 = vsyncadd [#allocation4], 4294966784 }
 0x237   :  { %347 = vsyncpa [#allocation3], 1 }
 0x238   :  { %348 = vsyncpa [#allocation4], 1 }

</bundles_post_ra>
